<compile_context>
chip_gen: v7x
topology: tpu7x:2x2x1
jax: 0.10.0
libtpu: 0.0.40
codegen_flags: <defaults>
</compile_context>

<pallas_src>
import functools

import jax
import jax.numpy as jnp
from jax import lax
from jax.experimental import pallas as pl
from jax.experimental.pallas import tpu as pltpu

_LANE = 128


def _attention_kernel(q_ref, k_ref, v_ref, scores_ref, out_ref, *,
                      scale_inv, lk_actual, lk_padded, use_bf16_mxu,
                      approx_reciprocal):
    # Refs (batch dim squeezed): q (tile_q, D), k (Lk_pad, D), v (Lk_pad, Dv).
    q = q_ref[...] * scale_inv          # fold 1/scale into q: tile_q*D VPU mults
    k = k_ref[...]
    v = v_ref[...]

    if use_bf16_mxu and q.dtype == jnp.float32:
        q = q.astype(jnp.bfloat16)
        k = k.astype(jnp.bfloat16)

    # scores = (q/scale) @ k^T -- contract last dims of both; no explicit transpose (no XLU).
    s = lax.dot_general(
        q, k,
        dimension_numbers=(((1,), (1,)), ((), ())),
        preferred_element_type=jnp.float32,
    )                                    # (tile_q, Lk_pad), f32

    if lk_actual != lk_padded:
        # Mask padded key columns so they get zero probability.
        col = lax.broadcasted_iota(jnp.int32, s.shape, dimension=1)
        s = jnp.where(col < lk_actual, s, -jnp.inf)

    # Numerically-stable softmax over the key axis (torch dim=2).
    m = jnp.max(s, axis=-1, keepdims=True)
    e = jnp.exp(s - m)
    denom = jnp.sum(e, axis=-1, keepdims=True)
    p = e * pl.reciprocal(denom, approx=approx_reciprocal)   # (tile_q, Lk_pad), f32

    scores_ref[...] = p.astype(scores_ref.dtype)

    # output = scores @ v ; feed MXU in (optionally bf16) input dtype, accumulate in f32.
    pv_dtype = jnp.bfloat16 if (use_bf16_mxu and v.dtype == jnp.float32) else v.dtype
    out_ref[...] = jnp.dot(
        p.astype(pv_dtype), v.astype(pv_dtype),
        preferred_element_type=jnp.float32,
    ).astype(out_ref.dtype)


def _sublane(dtype):
    return 16 if jnp.dtype(dtype).itemsize == 2 else 8


def _vmem_cap_bytes():
    """Per-generation scoped-VMEM ceiling (leave compiler scratch headroom)."""
    try:
        info = pltpu.get_tpu_info()
        cap = int(getattr(info, "vmem_capacity_bytes", 64 * 1024 * 1024))
    except Exception:  # pragma: no cover - conservative fallback off-TPU / old jax
        cap = 64 * 1024 * 1024
    if cap >= 100 * 1024 * 1024:
        return 100 * 1024 * 1024         # v5e / v6e: 128 MiB physical
    return 48 * 1024 * 1024              # v7x: 64 MiB physical


def _estimate_vmem_bytes(tile_q, d, dv, lk_pad, in_itemsize, out_itemsize):
    # BlockSpec double-buffers every block, including the grid-invariant k/v.
    blocks = 2 * (
        tile_q * d * in_itemsize          # q tile
        + lk_pad * d * in_itemsize        # k (resident)
        + lk_pad * dv * in_itemsize       # v (resident)
        + tile_q * lk_pad * out_itemsize  # scores tile
        + tile_q * dv * out_itemsize      # out tile
    )
    # f32 s / e / p intermediates plus small row vectors, with slack for regalloc spills.
    intermediates = 3 * tile_q * lk_pad * 4 + 2 * tile_q * max(d, dv) * 4
    return int(1.25 * (blocks + intermediates)) + (4 << 20)


def _choose_tile_q(lq, batch, d, dv, lk_pad, in_itemsize, out_itemsize, sublane, vmem_cap):
    def fits(t):
        return _estimate_vmem_bytes(t, d, dv, lk_pad, in_itemsize, out_itemsize) <= vmem_cap

    # Largest-first candidates that divide Lq and keep the (sublane,128) tiling legal.
    cands = [t for t in (1024, 512, 256, 128, 64, 32, 16, 8)
             if t <= lq and lq % t == 0 and t % sublane == 0]
    tile_q = None
    for t in cands:
        if fits(t):
            tile_q = t
            break
    if tile_q is None:
        # Nothing fits the budget (huge Lk) -> smallest legal tile; or irregular/tiny Lq
        # -> single full-extent block (legal because it equals the array dim).
        tile_q = cands[-1] if cands else lq

    # v7x megacore: ensure >= 2 parallel grid steps so the second TensorCore has work.
    while batch * (lq // tile_q) < 2:
        half = tile_q // 2
        if half >= sublane and lq % half == 0:
            tile_q = half
        else:
            break
    return tile_q


def attention(q, k, v, scale, *, approx_reciprocal=False, use_bf16_mxu=False,
              scores_buffer_count=2):
    """Pallas implementation of the torch Attention forward.

    Returns (attention_scores, output) exactly like the torch module.
    """
    B, Lq, D = q.shape
    Bk, Lk, Dk = k.shape
    Bv, Lkv, Dv = v.shape
    assert D == Dk and Bk == B and Bv == B and Lkv == Lk

    # Pad the key axis to a lane multiple so the scores store is an unmasked, lane-dense vst.
    lk_pad = Lk if Lk % _LANE == 0 else ((Lk + _LANE - 1) // _LANE) * _LANE
    if lk_pad != Lk:
        pad = [(0, 0), (0, lk_pad - Lk), (0, 0)]
        k = jnp.pad(k, pad)
        v = jnp.pad(v, pad)

    in_itemsize = jnp.dtype(q.dtype).itemsize
    out_itemsize = jnp.dtype(q.dtype).itemsize      # torch returns scores in input dtype
    sublane = _sublane(q.dtype)
    vmem_cap = _vmem_cap_bytes()

    tile_q = _choose_tile_q(Lq, B, D, Dv, lk_pad, in_itemsize, out_itemsize,
                            sublane, vmem_cap)
    num_q_tiles = Lq // tile_q

    vmem_estimate = _estimate_vmem_bytes(tile_q, D, Dv, lk_pad, in_itemsize, out_itemsize)
    vmem_limit = int(min(vmem_cap, max(vmem_estimate, 32 * 1024 * 1024)))

    kernel = functools.partial(
        _attention_kernel,
        scale_inv=1.0 / float(scale),
        lk_actual=Lk,
        lk_padded=lk_pad,
        use_bf16_mxu=use_bf16_mxu,
        approx_reciprocal=approx_reciprocal,
    )

    scores_spec_kwargs = {}
    if scores_buffer_count and scores_buffer_count != 2:
        scores_spec_kwargs["pipeline_mode"] = pl.Buffered(scores_buffer_count)

    scores, out = pl.pallas_call(
        kernel,
        out_shape=(
            jax.ShapeDtypeStruct((B, Lq, lk_pad), q.dtype),
            jax.ShapeDtypeStruct((B, Lq, Dv), q.dtype),
        ),
        grid_spec=pltpu.PrefetchScalarGridSpec(
            num_scalar_prefetch=0,
            grid=(B, num_q_tiles),
            in_specs=[
                pl.BlockSpec((pl.Squeezed(), tile_q, D), lambda b, i: (b, i, 0)),
                # k / v invariant across the Lq-tile axis -> stay resident in VMEM.
                pl.BlockSpec((pl.Squeezed(), lk_pad, D), lambda b, i: (b, 0, 0)),
                pl.BlockSpec((pl.Squeezed(), lk_pad, Dv), lambda b, i: (b, 0, 0)),
            ],
            out_specs=[
                pl.BlockSpec((pl.Squeezed(), tile_q, lk_pad), lambda b, i: (b, i, 0),
                             **scores_spec_kwargs),
                pl.BlockSpec((pl.Squeezed(), tile_q, Dv), lambda b, i: (b, i, 0)),
            ],
        ),
        compiler_params=pltpu.CompilerParams(
            dimension_semantics=("parallel", "parallel"),
            vmem_limit_bytes=vmem_limit,
        ),
    )(q, k, v)

    if lk_pad != Lk:
        scores = scores[:, :, :Lk]
    return scores, out


def _reference(q, k, v, scale):
    s = jax.nn.softmax(jnp.einsum("bqd,bkd->bqk", q, k) / scale, axis=2)
    o = jnp.einsum("bqk,bkd->bqd", s, v)
    return s, o


if __name__ == "__main__":
    B, Lq, Lk, D, Dv = 2, 8, 8, 32, 32
    key = jax.random.PRNGKey(0)
    kq, kk, kv = jax.random.split(key, 3)
    q = jax.random.normal(kq, (B, Lq, D), dtype=jnp.float32)
    k = jax.random.normal(kk, (B, Lk, D), dtype=jnp.float32)
    v = jax.random.normal(kv, (B, Lk, Dv), dtype=jnp.float32)
    scale = float(jnp.sqrt(D))  # deterministic module hyperparameter

    scores, out = attention(q, k, v, scale)
    jax.block_until_ready((scores, out))

    ref_scores, ref_out = _reference(q, k, v, scale)
    assert jnp.allclose(scores, ref_scores, atol=1e-5, rtol=1e-5)
    assert jnp.allclose(out, ref_out, atol=1e-5, rtol=1e-5)

    print("KERNEL_OK")
</pallas_src>

<mosaic_0001>
module attributes {stable_mosaic.version = 11 : i64} {
  func.func @_attention_kernel(%arg0: i32, %arg1: i32, %arg2: memref<1x8x32xf32, #tpu.memory_space<vmem>>, %arg3: memref<1x128x32xf32, #tpu.memory_space<vmem>>, %arg4: memref<1x128x32xf32, #tpu.memory_space<vmem>>, %arg5: memref<1x8x128xf32, #tpu.memory_space<vmem>>, %arg6: memref<1x8x32xf32, #tpu.memory_space<vmem>>) attributes {dimension_semantics = [#tpu.dimension_semantics<parallel>, #tpu.dimension_semantics<parallel>], iteration_bounds = array<i64: 2, 1>, scalar_prefetch = 0 : i64, scratch_operands = 0 : i64, tpu.core_type = #tpu.core_type<tc>, window_params = [{transform_indices = @transform_0, window_bounds = array<i64: 1, 8, 32>}, {transform_indices = @transform_1, window_bounds = array<i64: 1, 128, 32>}, {transform_indices = @transform_2, window_bounds = array<i64: 1, 128, 32>}, {transform_indices = @transform_3, window_bounds = array<i64: 1, 8, 128>}, {transform_indices = @transform_4, window_bounds = array<i64: 1, 8, 32>}]} {
    %c0 = arith.constant 0 : index
    %c0_0 = arith.constant 0 : index
    %c0_1 = arith.constant 0 : index
    %0 = vector.load %arg2[%c0, %c0_0, %c0_1] : memref<1x8x32xf32, #tpu.memory_space<vmem>>, vector<1x8x32xf32>
    %1 = vector.shape_cast %0 : vector<1x8x32xf32> to vector<8x32xf32>
    %cst = arith.constant 0.176776692 : f32
    %2 = vector.broadcast %cst : f32 to vector<8x32xf32>
    %3 = arith.mulf %1, %2 : vector<8x32xf32>
    %c0_2 = arith.constant 0 : index
    %c0_3 = arith.constant 0 : index
    %c0_4 = arith.constant 0 : index
    %4 = vector.load %arg3[%c0_2, %c0_3, %c0_4] : memref<1x128x32xf32, #tpu.memory_space<vmem>>, vector<1x128x32xf32>
    %5 = vector.shape_cast %4 : vector<1x128x32xf32> to vector<128x32xf32>
    %c0_5 = arith.constant 0 : index
    %c0_6 = arith.constant 0 : index
    %c0_7 = arith.constant 0 : index
    %6 = vector.load %arg4[%c0_5, %c0_6, %c0_7] : memref<1x128x32xf32, #tpu.memory_space<vmem>>, vector<1x128x32xf32>
    %7 = vector.shape_cast %6 : vector<1x128x32xf32> to vector<128x32xf32>
    %cst_8 = arith.constant dense<0.000000e+00> : vector<8x128xf32>
    %8 = tpu.matmul %3, %5, %cst_8 {dimension_numbers = #tpu.dot_dimension_numbers<[1], [1], [0], [0], [0, 0, 1, 0], [], []>} : vector<8x32xf32>, vector<128x32xf32>, vector<8x128xf32> -> vector<8x128xf32>
    %9 = tpu.iota {dimensions = array<i32: 1>} : vector<8x128xi32>
    %c8_i32 = arith.constant 8 : i32
    %10 = vector.broadcast %c8_i32 : i32 to vector<8x128xi32>
    %11 = arith.cmpi slt, %9, %10 : vector<8x128xi32>
    %cst_9 = arith.constant 0xFF800000 : f32
    %12 = vector.broadcast %cst_9 : f32 to vector<8x128xf32>
    %13 = arith.select %11, %8, %12 : vector<8x128xi1>, vector<8x128xf32>
    %cst_10 = arith.constant dense<0xFF800000> : vector<8xf32>
    %14 = vector.multi_reduction <maximumf>, %13, %cst_10 [1] : vector<8x128xf32> to vector<8xf32>
    %15 = vector.shape_cast %14 : vector<8xf32> to vector<8x1xf32>
    %16 = vector.broadcast %15 : vector<8x1xf32> to vector<8x128xf32>
    %17 = arith.subf %13, %16 : vector<8x128xf32>
    %18 = math.exp %17 : vector<8x128xf32>
    %cst_11 = arith.constant dense<0.000000e+00> : vector<8xf32>
    %19 = vector.multi_reduction <add>, %18, %cst_11 [1] : vector<8x128xf32> to vector<8xf32>
    %20 = vector.shape_cast %19 : vector<8xf32> to vector<8x1xf32>
    %21 = tpu.reciprocal %20 : vector<8x1xf32> -> vector<8x1xf32>
    %22 = vector.broadcast %21 : vector<8x1xf32> to vector<8x128xf32>
    %23 = arith.mulf %18, %22 : vector<8x128xf32>
    %c0_12 = arith.constant 0 : index
    %c0_13 = arith.constant 0 : index
    %c0_14 = arith.constant 0 : index
    %24 = vector.load %arg5[%c0_12, %c0_13, %c0_14] : memref<1x8x128xf32, #tpu.memory_space<vmem>>, vector<1x8x128xf32>
    %25 = vector.shape_cast %24 : vector<1x8x128xf32> to vector<8x128xf32>
    %26 = vector.shape_cast %23 : vector<8x128xf32> to vector<1x8x128xf32>
    tpu.vector_store %arg5[%c0_12, %c0_13, %c0_14], %26 {strides = array<i32>} : memref<1x8x128xf32, #tpu.memory_space<vmem>>, vector<1x8x128xf32>,
    %cst_15 = arith.constant dense<0.000000e+00> : vector<8x32xf32>
    %27 = tpu.matmul %23, %7, %cst_15 {dimension_numbers = #tpu.dot_dimension_numbers<[1], [0], [0], [1], [0, 0, 1, 1], [], []>} : vector<8x128xf32>, vector<128x32xf32>, vector<8x32xf32> -> vector<8x32xf32>
    %c0_16 = arith.constant 0 : index
    %c0_17 = arith.constant 0 : index
    %c0_18 = arith.constant 0 : index
    %28 = vector.load %arg6[%c0_16, %c0_17, %c0_18] : memref<1x8x32xf32, #tpu.memory_space<vmem>>, vector<1x8x32xf32>
    %29 = vector.shape_cast %28 : vector<1x8x32xf32> to vector<8x32xf32>
    %30 = vector.shape_cast %27 : vector<8x32xf32> to vector<1x8x32xf32>
    tpu.vector_store %arg6[%c0_16, %c0_17, %c0_18], %30 {strides = array<i32>} : memref<1x8x32xf32, #tpu.memory_space<vmem>>, vector<1x8x32xf32>,
    return
  }
  func.func @transform_0(%arg0: i32, %arg1: i32) -> (i32, i32, i32) {
    %c0_i32 = arith.constant 0 : i32
    %c0_i32_0 = arith.constant 0 : i32
    return %arg0, %arg1, %c0_i32 : i32, i32, i32
  }
  func.func @transform_1(%arg0: i32, %arg1: i32) -> (i32, i32, i32) {
    %c0_i32 = arith.constant 0 : i32
    %c0_i32_0 = arith.constant 0 : i32
    %c0_i32_1 = arith.constant 0 : i32
    return %arg0, %c0_i32, %c0_i32_0 : i32, i32, i32
  }
  func.func @transform_2(%arg0: i32, %arg1: i32) -> (i32, i32, i32) {
    %c0_i32 = arith.constant 0 : i32
    %c0_i32_0 = arith.constant 0 : i32
    %c0_i32_1 = arith.constant 0 : i32
    return %arg0, %c0_i32, %c0_i32_0 : i32, i32, i32
  }
  func.func @transform_3(%arg0: i32, %arg1: i32) -> (i32, i32, i32) {
    %c0_i32 = arith.constant 0 : i32
    %c0_i32_0 = arith.constant 0 : i32
    return %arg0, %arg1, %c0_i32 : i32, i32, i32
  }
  func.func @transform_4(%arg0: i32, %arg1: i32) -> (i32, i32, i32) {
    %c0_i32 = arith.constant 0 : i32
    %c0_i32_0 = arith.constant 0 : i32
    return %arg0, %arg1, %c0_i32 : i32, i32, i32
  }
}

</mosaic_0001>

<bundles_post_ra>
// kernel: tpu_custom_call.1
= control target key start
LH: loop header
LB: loop body
LE: loop exit
PB: predicated region body
PF: predicated region fallthrough
CT: control target
= control target key end

     0   :  { %10 = vsyncpa [#allocation3], 0  ;;  %s1317_s0 = inlined_call_operand.vmem [shape: f32[2,8,32], index: 0, kind: input, shape index: {}]   ;;  %s1318_s1 = inlined_call_operand.vmem [shape: f32[2,128,32], index: 1, kind: input, shape index: {}]   ;;  %s1319_s2 = inlined_call_operand.vmem [shape: f32[2,128,32], index: 2, kind: input, shape index: {}]   ;;  %s1320_s3 = inlined_call_operand.hbm [shape: f32[2,8,128], index: 3, kind: output, shape index: {0}]   ;;  %s1321_s4 = inlined_call_operand.hbm [shape: f32[2,8,32], index: 4, kind: output, shape index: {1}]  }
   0x1   :  { %12 = vsyncpa [#allocation3 + $0x1], 0 }
   0x2   :  { %13 = vsyncpa [#allocation5], 0 }
   0x3   :  { %15 = vsyncpa [#allocation5 + $0x1], 0  ;;  %s1080_s15 = smov 0   ;;  %s1082_s16 = smov 0  }
   0x4   :  { %s1084_s17 = smov 0   ;;  %s1086_s18 = smov 0  }
   0x5   :  { %s1088_s19 = smov 0   ;;  %s1090_s20 = smov 0  }
   0x6 LB: > { %s674_s21 = sadd.s32 4294967295, %s1048_s20   ;;  %s675_s22 = sadd.s32 4294967294, %s1048_s20   ;;  %s1048_s20 = sphi %s1090_s20, %s21_s20   ;;  %s1044_s19 = sphi %s1088_s19, %s1330_s19   ;;  %s1040_s18 = sphi %s1086_s18, %s1329_s18   ;;  %s1036_s17 = sphi %s1084_s17, %s1328_s17   ;;  %s1032_s16 = sphi %s1082_s16, %s1327_s16   ;;  %s1028_s15 = sphi %s1080_s15, %s1326_s15  }
   0x7   : > { %s33_s23 = sadd.s32 1, %s1044_s19  ;;  %s122_s24 = sadd.s32 1, %s1036_s17 }
   0x8   : > { %p35_p0 = scmp.ge.s32.totalorder %s33_s23, 2  ;;  %p132_p1 = scmp.ne.s32.totalorder %s1036_s17, %s1032_s16 }
   0x9   : > { %p133_p2 = scmp.eq.s32.totalorder %s674_s21, 1  ;;  %p138_p3 = scmp.ne.s32.totalorder %s1032_s16, %s1028_s15 }
   0xa   : > { %s1332_s23 = smov (%p35_p0, %s33_s23), 0  ;;  %p139_p5 = scmp.eq.s32.totalorder %s675_s22, 1 }
   0xb   : > { %p1120_p4 = por %p133_p2, %p132_p1  ;;  %s117_s26 = ssub.s32 %s1044_s19, %s1332_s23 }
   0xc   : > { %p678_p6 = scmp.ge.s32.totalorder %s1048_s20, 1  ;;  %p120_p7 = scmp.eq.s32.totalorder %s117_s26, 0 }
   0xd   : > { %p1127_p8 = por %p139_p5, %p138_p3  ;;  %p211_p9 = scmp.lt.s32.totalorder %s1048_s20, 3 }
   0xe   : > { %s1133_s28 = scalar_select %p120_p7, %s1036_s17, %s122_s24  }
   0xf   : > { %p212_p10 = pnand %p678_p6, %p211_p9 }
  0x10   : > { %p254_p11 = scmp.lt.s32.totalorder (!%p212_p10), %s1040_s18, 1  ;;  %v1050_v0 = vmov (!%p212_p10), 0.0|0.0   ;;  %vm1051_vm0 = vmmov (!%p212_p10), 0   ;;  %v1052_v1 = vmov (!%p212_p10), 0.0   ;;  %vm305_vm1 = vcmask (!%p212_p10), 261120   ;;  %s1230_s21 = sand.u32 (!%p212_p10), 1, %s1032_s16  }
  0x11   : > { %215 = sbr.rel (%p212_p10) target bundleno = 845 (0x34d), region = 32  ;;  %815 = vmatprep.subr.bf16.mxu0 (!%p212_p10), %v1050_v0  ;;  %777 = vmatprep.mubr.msk.f32.mxu0 (!%p212_p10), %vm1051_vm0, %v1052_v1  ;;  %vm1153_vm2 = vmpackc.low (!%p212_p10), %vm305_vm1, %vm305_vm1  ;;  %v427_v29 = vlaneseq (!%p212_p10)  ;;  %s679_s22 = sshll.u32 (!%p212_p10), %s1230_s21, 3 }
  0x12   : > { %847 = vmatprep.subr.bf16.mxu1 (!%p212_p10), %v1050_v0  ;;  %812 = vmatprep.mubr.msk.f32.mxu1 (!%p212_p10), %vm1051_vm0, %v1052_v1  ;;  %s246_s24 = scalar_lea.vmem (!%p212_p10), [#allocation2], %s679_s22  ;;  %s705_s26 = sshll.u32 (!%p212_p10), %s1040_s18, 7 }
  0x13   : > { %v428_v30 = vand.u32 (!%p212_p10), 127, %v427_v29  ;;  %s1241_s6 = scalar_lea.hbm (!%p212_p10), %s1320_s3, %s705_s26  ;;  %s1053_s9 = smov (!%p212_p10), [#allocation2]  }
  0x14   : > { %s942_s10 = sshll.u32 (!%p212_p10), %s1053_s9, 4  ;;  %s943_s10 = int_to_ptr.vmem [resolvable:$false] %s942_s10 }
  0x15   : > { %vm429_vm3 = vcmp.lt.s32.totalorder (!%p212_p10), %v428_v30, 8 }
  0x18   : > { %s1138_s29 = scalar_select %p254_p11, %s1040_s18, 1 }
  0x1a   : > { %s709_s30 = sshll.u32 %s1138_s29, 7  ;;  %s681_s8 = sshll.u32 %s1138_s29, 3 }
  0x1b   : > { %s1147_s7 = scalar_lea.vmem %s1318_s1, %s709_s30  ;;  %s260_s11 = scalar_lea.vmem %s1317_s0, %s681_s8 }
  0x1c   : > { %v273_v2 = vld [vmem:[%s1147_s7] sm:$0xff]  ;;  %v274_v3 = vld [vmem:[%s1147_s7 + $0x8] sm:$0xff]  ;;  %v275_v6 = vld [vmem:[%s1147_s7 + $0x10] sm:$0xff]  ;;  %s1204_s14 = scalar_lea.vmem %s1319_s2, %s709_s30  ;;  %s532_s29 = sshll.u32 %s246_s24, 4  ;;  %s533_s29 = int_to_ptr.vmem [resolvable:$true] %s532_s29 }
  0x1d   : > { %v816_v5 = vpack.c.bf16 %v274_v3, %v273_v2  ;;  %v276_v7 = vld [vmem:[%s1147_s7 + $0x18] sm:$0xff]  ;;  %v277_v9 = vld [vmem:[%s1147_s7 + $0x20] sm:$0xff]  ;;  %v278_v10 = vld [vmem:[%s1147_s7 + $0x28] sm:$0xff]  ;;  %s938_s8 = scalar_lea.vmem %s533_s29, 128  ;;  %p945_p1 = scmp.lt.s32.totalorder %s533_s29, %s943_s10 }
  0x1e   : > { %v820_v8 = vpack.c.bf16 %v276_v7, %v275_v6  ;;  %v824_v11 = vpack.c.bf16 %v278_v10, %v277_v9  ;;  %v279_v12 = vld [vmem:[%s1147_s7 + $0x30] sm:$0xff]  ;;  %v280_v13 = vld [vmem:[%s1147_s7 + $0x38] sm:$0xff]  ;;  %v281_v15 = vld [vmem:[%s1147_s7 + $0x40] sm:$0xff]  ;;  %p939_p12 = scmp.ne.s32.totalorder %s533_s29, %s938_s8 }
  0x1f   : > { %818 = vmatpush3.bf16.xpose.msk.msra.mxu0 %vm1153_vm2, %v816_v5  ;;  %v828_v14 = vpack.c.bf16 %v280_v13, %v279_v12  ;;  %v282_v16 = vld [vmem:[%s1147_s7 + $0x48] sm:$0xff]  ;;  %v283_v18 = vld [vmem:[%s1147_s7 + $0x50] sm:$0xff]  ;;  %v284_v19 = vld [vmem:[%s1147_s7 + $0x58] sm:$0xff] }
  0x20   : > { %819 = vmatprep.subr.bf16.mxu0 %v1050_v0  ;;  %v832_v17 = vpack.c.bf16 %v282_v16, %v281_v15  ;;  %v836_v20 = vpack.c.bf16 %v284_v19, %v283_v18  ;;  %v285_v21 = vld [vmem:[%s1147_s7 + $0x60] sm:$0xff]  ;;  %v286_v22 = vld [vmem:[%s1147_s7 + $0x68] sm:$0xff]  ;;  %v287_v24 = vld [vmem:[%s1147_s7 + $0x70] sm:$0xff]  ;;  %p940_p13 = pnand %p939_p12, %p1120_p4 }
  0x21   : > { %v840_v23 = vpack.c.bf16 %v286_v22, %v285_v21  ;;  %v288_v25 = vld [vmem:[%s1147_s7 + $0x78] sm:$0xff]  ;;  %v271_v27 = vld [vmem:[%s260_s11] sm:$0xff]  ;;  %v290_v35 = vld [vmem:[%s1204_s14 + $0x8] sm:$0xff]  ;;  %s513_s7 = scalar_lea.sflag [#allocation3], %s1230_s21  ;;  %s944_s11 = scalar_lea.vmem %s943_s10, 256 }
  0x22   : > { %v844_v26 = vpack.c.bf16 %v288_v25, %v287_v24  ;;  %v272_v28 = vmul.f32 0.17677669, %v271_v27  ;;  %v289_v34 = vld [vmem:[%s1204_s14] sm:$0xff]  ;;  %v291_v36 = vld [vmem:[%s1204_s14 + $0x10] sm:$0xff]  ;;  %v292_v38 = vld [vmem:[%s1204_s14 + $0x18] sm:$0xff]  ;;  %p941_p0 = pneg %p940_p13  ;;  %p946_p2 = scmp.lt.s32.totalorder %s944_s11, %s938_s8 }
  0x23   : > { %v848_v37 = vpack.c.bf16 %v290_v35, %v289_v34  ;;  %v851_v39 = vpack.c.bf16 %v292_v38, %v291_v36  ;;  %v293_v40 = vld [vmem:[%s1204_s14 + $0x20] sm:$0xff]  ;;  %v294_v41 = vld [vmem:[%s1204_s14 + $0x28] sm:$0xff]  ;;  %v295_v43 = vld [vmem:[%s1204_s14 + $0x30] sm:$0xff] }
  0x24   : > { %v854_v42 = vpack.c.bf16 %v294_v41, %v293_v40  ;;  %v296_v44 = vld [vmem:[%s1204_s14 + $0x38] sm:$0xff]  ;;  %v297_v46 = vld [vmem:[%s1204_s14 + $0x40] sm:$0xff]  ;;  %v298_v47 = vld [vmem:[%s1204_s14 + $0x48] sm:$0xff]  ;;  %p947_p3 = por %p946_p2, %p945_p1 }
  0x25   : > { %849 = vmatpush3.bf16.msra.mxu1 %v848_v37  ;;  %v857_v45 = vpack.c.bf16 %v296_v44, %v295_v43  ;;  %v860_v48 = vpack.c.bf16 %v298_v47, %v297_v46  ;;  %v299_v53 = vld [vmem:[%s1204_s14 + $0x50] sm:$0xff]  ;;  %v300_v54 = vld [vmem:[%s1204_s14 + $0x58] sm:$0xff]  ;;  %v301_v56 = vld [vmem:[%s1204_s14 + $0x60] sm:$0xff] }
  0x26   : > { %850 = vmatprep.subr.bf16.mxu1 %v1050_v0  ;;  %v863_v55 = vpack.c.bf16 %v300_v54, %v299_v53  ;;  %v302_v57 = vld [vmem:[%s1204_s14 + $0x68] sm:$0xff]  ;;  %v303_v59 = vld [vmem:[%s1204_s14 + $0x70] sm:$0xff]  ;;  %v304_v60 = vld [vmem:[%s1204_s14 + $0x78] sm:$0xff]  ;;  %p948_p5 = pnand %p947_p3, %p941_p0 }
  0x27   : > { %822 = vmatpush3.bf16.xpose.msk.msra.mxu0 %vm1153_vm2, %v820_v8  ;;  %v866_v58 = vpack.c.bf16 %v302_v57, %v301_v56  ;;  %v869_v61 = vpack.c.bf16 %v304_v60, %v303_v59 }
  0x28   : > { %823 = vmatprep.subr.bf16.mxu0 %v1050_v0 }
  0x29   : > { %852 = vmatpush3.bf16.msra.mxu1 %v851_v39 }
  0x2a   : > { %853 = vmatprep.subr.bf16.mxu1 %v1050_v0 }
  0x2d   : > { %855 = vmatpush3.bf16.msra.mxu1 %v854_v42 }
  0x2e   : > { %856 = vmatprep.subr.bf16.mxu1 %v1050_v0 }
  0x2f   : > { %826 = vmatpush3.bf16.xpose.msk.msra.mxu0 %vm1153_vm2, %v824_v11 }
  0x30   : > { %827 = vmatprep.subr.bf16.mxu0 %v1050_v0 }
  0x31   : > { %858 = vmatpush3.bf16.msra.mxu1 %v857_v45 }
  0x32   : > { %859 = vmatprep.subr.bf16.mxu1 %v1050_v0 }
  0x35   : > { %861 = vmatpush3.bf16.msra.mxu1 %v860_v48 }
  0x36   : > { %862 = vmatprep.subr.bf16.mxu1 %v1050_v0 }
  0x37   : > { %830 = vmatpush3.bf16.xpose.msk.msra.mxu0 %vm1153_vm2, %v828_v14 }
  0x38   : > { %831 = vmatprep.subr.bf16.mxu0 %v1050_v0 }
  0x39   : > { %864 = vmatpush3.bf16.msra.mxu1 %v863_v55 }
  0x3a   : > { %865 = vmatprep.subr.bf16.mxu1 %v1050_v0 }
  0x3d   : > { %867 = vmatpush3.bf16.msra.mxu1 %v866_v58 }
  0x3e   : > { %868 = vmatprep.subr.bf16.mxu1 %v1050_v0 }
  0x3f   : > { %834 = vmatpush3.bf16.xpose.msk.msra.mxu0 %vm1153_vm2, %v832_v17 }
  0x40   : > { %835 = vmatprep.subr.bf16.mxu0 %v1050_v0 }
  0x41   : > { %870 = vmatpush3.bf16.msra.mxu1 %v869_v61 }
  0x47   : > { %838 = vmatpush3.bf16.xpose.msk.msra.mxu0 %vm1153_vm2, %v836_v20 }
  0x48   : > { %839 = vmatprep.subr.bf16.mxu0 %v1050_v0 }
  0x4f   : > { %842 = vmatpush3.bf16.xpose.msk.msra.mxu0 %vm1153_vm2, %v840_v23 }
  0x50   : > { %843 = vmatprep.subr.bf16.mxu0 %v1050_v0 }
  0x57   : > { %846 = vmatpush3.bf16.xpose.msk.msra.mxu0 %vm1153_vm2, %v844_v26 }
  0x5e   : > { %778 = vmatmul.mubr.msk.f32.vlgmr.msra.gmra.mrb[0].mxu0 %vm305_vm1, %v272_v28 }
 0x131   : > { %v423_v31 = vpop.f32.mrb[0].mxu0 }
 0x132   : > { %v779_v32 = vpop.f32.mrb[1].mxu0  ;;  %v430_v33 = vsel %vm429_vm3, %v423_v31, -inf }
 0x133   : > { %431 = vmax.xlane.f32.xlu0 %v430_v33 }
 0x1c0   : > { %v432_v49 = vpop.xlane.xlu0 %431 }
 0x1c1   : > { %v433_v50 = vsub.f32 %v430_v33, %v432_v49 }
 0x1c3   : > { %v434_v51 = vmul.f32 1.442695, %v433_v50 }
 0x1c5   : > { %934 = vpow2.f32 %v434_v51 }
 0x1cf   : > { %v935_v52 = vpop.eup %934 }
 0x1d0   : > { %436 = vadd.xlane.f32.xlu0 %v935_v52 }
 0x25d   : > { %v437_v62 = vpop.xlane.xlu0 %436 }
 0x25e   : > { %936 = vrcp.f32 %v437_v62 }
 0x268   : > { %v937_v63 = vpop.eup %936 }
 0x269   : > { %v439_v1 = vmul.f32 %v937_v63, %v935_v52 }
 0x26b   : > { %813 = vmatmul.mubr.f32.vlgmr.msra.gmra.mrb[0].mxu1 %v439_v1  ;;  %440 = vst [vmem:[%s246_s24] sm:$0xff] %v439_v1 }
 0x26c   : > { %951 = shalt.err (!%p948_p5)
}
 0x26d   : > { %s952_s12 = scalar_lea.hbm %s1241_s6, 128  ;;  %s956_s24 = scalar_lea.hbm %s1320_s3, 256 }
 0x26e   : > { %p953_p6 = scmp.ne.s32.totalorder %s1241_s6, %s952_s12  ;;  %p957_p10 = scmp.lt.u32.totalorder %s1241_s6, %s1320_s3 }
 0x26f   : > { %p958_p11 = scmp.lt.u32.totalorder %s956_s24, %s952_s12  ;;  %p960_p13 = scmp.lt.u32.totalorder %s952_s12, %s1241_s6 }
 0x270   : > { %p954_p7 = pnand %p953_p6, %p1120_p4 }
 0x271   : > { %p959_p12 = por %p958_p11, %p957_p10 }
 0x272   : > { %p955_p9 = pneg %p954_p7 }
 0x273   : > { %p961_p0 = por %p960_p13, %p959_p12 }
 0x275   : > { %p962_p1 = pnand %p961_p0, %p955_p9 }
 0x277   : > { %965 = shalt.err (!%p962_p1)
}
 0x278   : > { %871 = dma.vmem_to_hbm [thread:$0]  (%p1120_p4), %s533_s29, 128, %s1241_s6, %s513_s7  }
 0x279   : > { %s253_s8 = scalar_lea.vmem [#allocation4], %s679_s22  ;;  %s1268_s13 = scalar_lea.hbm %s1321_s4, %s705_s26 }
 0x27a   : > { %s546_s9 = sshll.u32 %s253_s8, 4  ;;  %s518_s12 = scalar_lea.sflag [#allocation5], %s1230_s21  ;;  %s1270_s9 = int_to_ptr.vmem [resolvable:$true] %s546_s9 }
 0x27b   : > { %s966_s29 = scalar_lea.vmem %s1270_s9, 128  ;;  %s1054_s18 = smov [#allocation4]  }
 0x27c   : > { %p967_p2 = scmp.ne.s32.totalorder %s1270_s9, %s966_s29  ;;  %s970_s22 = sshll.u32 %s1054_s18, 4  ;;  %s971_s22 = int_to_ptr.vmem [resolvable:$false] %s970_s22 }
 0x27d   : > { %s972_s26 = scalar_lea.vmem %s971_s22, 256  ;;  %p973_p6 = scmp.lt.s32.totalorder %s1270_s9, %s971_s22 }
 0x27e   : > { %p968_p3 = pnand %p967_p2, %p1120_p4  ;;  %p974_p7 = scmp.lt.s32.totalorder %s972_s26, %s966_s29 }
 0x280   : > { %p969_p5 = pneg %p968_p3  ;;  %p975_p9 = por %p974_p7, %p973_p6 }
 0x282   : > { %p976_p10 = pnand %p975_p9, %p969_p5 }
 0x33e   : > { %v507_v0 = vpop.f32.mrb[0].mxu1 }
 0x33f   : > { %511 = vst.msk [vmem:[%s253_s8] sm:$0xff] %vm305_vm1, %v507_v0  ;;  %v814_v2 = vpop.f32.mrb[1].mxu1 }
 0x340   : > { %979 = shalt.err (!%p976_p10)
}
 0x341   : > { %s980_s21 = scalar_lea.hbm %s1268_s13, 128  ;;  %s984_s14 = scalar_lea.hbm %s1321_s4, 256 }
 0x342   : > { %p981_p11 = scmp.ne.s32.totalorder %s1268_s13, %s980_s21  ;;  %p985_p0 = scmp.lt.u32.totalorder %s1268_s13, %s1321_s4 }
 0x343   : > { %p986_p1 = scmp.lt.u32.totalorder %s984_s14, %s980_s21  ;;  %p988_p3 = scmp.lt.u32.totalorder %s980_s21, %s1268_s13 }
 0x344   : > { %p982_p12 = pnand %p981_p11, %p1120_p4 }
 0x345   : > { %p987_p2 = por %p986_p1, %p985_p0 }
 0x346   : > { %p983_p13 = pneg %p982_p12 }
 0x347   : > { %p989_p5 = por %p988_p3, %p987_p2 }
 0x349   : > { %p990_p6 = pnand %p989_p5, %p983_p13 }
 0x34b   : > { %993 = shalt.err (!%p990_p6)
}
 0x34c   : > { %872 = dma.vmem_to_hbm [thread:$0]  (%p1120_p4), %s1270_s9, 128, %s1268_s13, %s518_s12  }
 0x34d PF: > { %p882_p7 = scmp.ge.s32.totalorder %s1048_s20, 2  ;;  %s558_s5 = sand.u32 1, %s1028_s15  }
 0x34e   : > { %s559_s8 = scalar_lea.sflag [#allocation3], %s558_s5 }
 0x34f   : > { %p876_p9 = pnand %p882_p7, %p1127_p8 }
 0x351   : > { %1019 = dma.done.wait (!%p876_p9), %s559_s8, 128  }
 0x352   : > { %1021 = vsyncadd (!%p876_p9), %s559_s8, 4294967168  ;;  %s568_s10 = scalar_lea.sflag [#allocation5], %s558_s5 }
 0x353   : > { %1023 = dma.done.wait (!%p876_p9), %s568_s10, 128  }
 0x354   : > { %1025 = vsyncadd (!%p876_p9), %s568_s10, 4294967168  ;;  %s21_s20 = sadd.s32 1, %s1048_s20   ;;  %s1326_s15 = smov %s1032_s16 }
 0x355   : > { %p18_p10 = scmp.ge.s32.totalorder %s21_s20, 4   ;;  %s1327_s16 = smov %s1036_s17 }
 0x356   : > { %s1328_s17 = smov %s1133_s28  ;;  %s1329_s18 = smov %s1044_s19 }
 0x357   : > { %s1330_s19 = smov %s1332_s23  ;;  %20 = sbr.rel (!%p18_p10) target bundleno = 6 (0x6), region = 90 }
 0x35e   :  { %573 = vsyncpa [#allocation3], 1 }
 0x35f   :  { %575 = vsyncpa [#allocation3 + $0x1], 1 }
 0x360   :  { %576 = vsyncpa [#allocation5], 1 }
 0x361   :  { %578 = vsyncpa [#allocation5 + $0x1], 1 }

</bundles_post_ra>
